<compile_context>
chip_gen: v7x
topology: tpu7x:2x2x1
jax: 0.10.0
libtpu: 0.0.40
codegen_flags: <defaults>
</compile_context>

<pallas_src>
import functools

import jax
import jax.numpy as jnp
from jax.experimental import pallas as pl
from jax.experimental.pallas import tpu as pltpu


# ---------------------------------------------------------------------------
# Fused single-shot kernel (small inputs): stats + fold + normalize in VMEM.
# ---------------------------------------------------------------------------
def _fused_kernel(x_ref, gamma_ref, beta_ref, o_ref, *, eps, act, count):
    x = x_ref[...].astype(jnp.float32)                 # (B, C, S)
    # Two explicit reduction steps (lanes, then batch) keep the lowering simple.
    s = jnp.sum(jnp.sum(x, axis=2, keepdims=True), axis=0, keepdims=True)       # (1, C, 1)
    sq = jnp.sum(jnp.sum(x * x, axis=2, keepdims=True), axis=0, keepdims=True)  # (1, C, 1)
    inv_n = 1.0 / count
    mean = s * inv_n
    var = jnp.maximum(sq * inv_n - mean * mean, 0.0)   # biased var (train-mode BN)
    inv = jax.lax.rsqrt(var + eps)                     # EUP
    scale = gamma_ref[...].astype(jnp.float32) * inv   # (1, C, 1)
    bias = beta_ref[...].astype(jnp.float32) - mean * scale
    y = x * scale + bias
    if act:
        y = jnp.maximum(y, 0.0)
    o_ref[...] = y.astype(o_ref.dtype)


# ---------------------------------------------------------------------------
# Pass 1 (general path): per-row sum / sum-of-squares, accumulated across the
# (batch, tile) grid. Output block index is constant -> resident accumulator,
# written back once at the end of the grid.
# ---------------------------------------------------------------------------
def _stats_kernel(x_ref, sum_ref, sq_ref):
    @pl.when((pl.program_id(0) == 0) & (pl.program_id(1) == 0))
    def _():
        sum_ref[...] = jnp.zeros_like(sum_ref)
        sq_ref[...] = jnp.zeros_like(sq_ref)

    x = x_ref[...].astype(jnp.float32)          # (1, R, TILE_L)
    sum_ref[...] += jnp.sum(x, axis=-1)         # (1, R)
    sq_ref[...] += jnp.sum(x * x, axis=-1)      # (1, R)


# ---------------------------------------------------------------------------
# Pass 2 (general path): y = relu(x * scale + bias), pure load-mul-add-store.
# ---------------------------------------------------------------------------
def _scale_kernel(x_ref, scale_ref, bias_ref, o_ref, *, act):
    x = x_ref[...].astype(jnp.float32)          # (1, R, TILE_L)
    y = x * scale_ref[...][..., None] + bias_ref[...][..., None]
    if act:
        y = jnp.maximum(y, 0.0)
    o_ref[...] = y.astype(o_ref.dtype)


def _pick_lane_tile(L, R, bytes_per_elem, budget_bytes=2 * 1024 * 1024):
    """Largest multiple-of-128 tile that divides L and fits the byte budget."""
    if L % 128 != 0:
        return L  # tiny / unaligned spatial extent: take the full row
    max_lanes = max(128, (budget_bytes // (R * bytes_per_elem)) // 128 * 128)
    t = min(L, max_lanes)
    while t > 128 and L % t != 0:
        t -= 128
    return t


def _bn_act_fused(x3, gamma, beta, *, eps, act):
    """Single fused kernel; valid when the whole tensor fits in VMEM."""
    B, C, S = x3.shape
    gamma3 = gamma.astype(jnp.float32).reshape(1, C, 1)
    beta3 = beta.astype(jnp.float32).reshape(1, C, 1)
    return pl.pallas_call(
        functools.partial(_fused_kernel, eps=eps, act=act, count=float(B * S)),
        out_shape=jax.ShapeDtypeStruct((B, C, S), x3.dtype),
        compiler_params=pltpu.CompilerParams(
            vmem_limit_bytes=32 * 1024 * 1024,
        ),
    )(x3, gamma3, beta3)


def _bn_act_two_pass(x_flat, gamma, beta, *, eps, act, C, k):
    """General two-pass path; x_flat is (B, R, L) with R = C * k."""
    B, R, L = x_flat.shape
    S_per_batch = R * L // C * 1  # = H*W * 1 ; count uses B * H * W below
    tile_l = _pick_lane_tile(L, R, x_flat.dtype.itemsize)
    n_tiles = L // tile_l

    # --- pass 1: per-row sum / sumsq -----------------------------------------
    row_sum, row_sq = pl.pallas_call(
        _stats_kernel,
        out_shape=(
            jax.ShapeDtypeStruct((1, R), jnp.float32),
            jax.ShapeDtypeStruct((1, R), jnp.float32),
        ),
        grid_spec=pltpu.PrefetchScalarGridSpec(
            num_scalar_prefetch=0,
            grid=(B, n_tiles),
            in_specs=[pl.BlockSpec((1, R, tile_l), lambda b, t: (b, 0, t))],
            out_specs=[
                pl.BlockSpec((1, R), lambda b, t: (0, 0)),
                pl.BlockSpec((1, R), lambda b, t: (0, 0)),
            ],
        ),
        compiler_params=pltpu.CompilerParams(
            dimension_semantics=("arbitrary", "arbitrary"),
            vmem_limit_bytes=32 * 1024 * 1024,
        ),
    )(x_flat)

    # --- tiny O(C) fold: batch stats -> per-channel affine (plain XLA) -------
    count = jnp.float32(B * k * L)
    ch_sum = row_sum.reshape(C, k).sum(axis=1)
    ch_sq = row_sq.reshape(C, k).sum(axis=1)
    mean = ch_sum / count
    var = jnp.maximum(ch_sq / count - mean * mean, 0.0)  # biased var (train-mode BN)
    inv = jax.lax.rsqrt(var + eps)
    scale_c = gamma.astype(jnp.float32) * inv
    bias_c = beta.astype(jnp.float32) - mean * scale_c
    scale_r = jnp.repeat(scale_c, k).reshape(1, R)
    bias_r = jnp.repeat(bias_c, k).reshape(1, R)

    # --- pass 2: streamed normalize + ReLU ------------------------------------
    return pl.pallas_call(
        functools.partial(_scale_kernel, act=act),
        out_shape=jax.ShapeDtypeStruct((B, R, L), x_flat.dtype),
        grid_spec=pltpu.PrefetchScalarGridSpec(
            num_scalar_prefetch=0,
            grid=(B, n_tiles),
            in_specs=[
                pl.BlockSpec((1, R, tile_l), lambda b, t: (b, 0, t)),
                pl.BlockSpec((1, R), lambda b, t: (0, 0)),
                pl.BlockSpec((1, R), lambda b, t: (0, 0)),
            ],
            out_specs=pl.BlockSpec((1, R, tile_l), lambda b, t: (b, 0, t)),
        ),
        compiler_params=pltpu.CompilerParams(
            dimension_semantics=("parallel", "parallel"),
            vmem_limit_bytes=32 * 1024 * 1024,
        ),
    )(x_flat, scale_r, bias_r)


def bn_act_2d(x, gamma, beta, *, eps=1e-5, act=True, force_two_pass=False):
    """BatchNorm2d (batch statistics) + optional ReLU. x: (B, C, H, W)."""
    B, C, H, W = x.shape
    S = H * W

    # --- fused fast path: whole tensor fits comfortably in VMEM --------------
    total_f32_bytes = B * C * S * 4
    if not force_two_pass and total_f32_bytes <= 2 * 1024 * 1024:
        out3 = _bn_act_fused(x.reshape(B, C, S), gamma, beta, eps=eps, act=act)
        return out3.reshape(B, C, H, W)

    # --- general path: sublane packing (fold spatial into channels if C < 8) -
    k = 1
    if C < 8 and 8 % C == 0:
        cand = 8 // C
        if S % cand == 0 and (S // cand) % 128 == 0:
            k = cand
    R = C * k
    L = S // k
    x_flat = x.reshape(B, R, L)

    out_flat = _bn_act_two_pass(x_flat, gamma, beta, eps=eps, act=act, C=C, k=k)
    return out_flat.reshape(B, C, H, W)


def _reference(x, gamma, beta, eps=1e-5, act=True):
    mean = jnp.mean(x, axis=(0, 2, 3))
    var = jnp.var(x, axis=(0, 2, 3))  # biased variance, as used by train-mode BN
    inv = jax.lax.rsqrt(var + eps)
    y = (x - mean[None, :, None, None]) * inv[None, :, None, None]
    y = y * gamma[None, :, None, None] + beta[None, :, None, None]
    return jnp.maximum(y, 0.0) if act else y


if __name__ == "__main__":
    B, C, H, W = 2, 4, 16, 16

    key = jax.random.PRNGKey(0)
    kx, kg, kb = jax.random.split(key, 3)

    x = jax.random.normal(kx, (B, C, H, W), dtype=jnp.float32)
    # BatchNorm2d default init is gamma=1, beta=0; perturb so the affine path
    # is actually exercised.
    gamma = 1.0 + 0.1 * jax.random.normal(kg, (C,), dtype=jnp.float32)
    beta = 0.1 * jax.random.normal(kb, (C,), dtype=jnp.float32)

    ref = _reference(x, gamma, beta, eps=1e-5, act=True)

    # Fused single-kernel path (used automatically for small tensors).
    out_fused = jax.block_until_ready(bn_act_2d(x, gamma, beta, eps=1e-5, act=True))
    assert out_fused.shape == (B, C, H, W)
    assert jnp.allclose(out_fused, ref, atol=1e-4, rtol=1e-4), "fused path mismatch"

    # General two-pass path (what large tensors would use); verify it too.
    out_tp = jax.block_until_ready(
        bn_act_2d(x, gamma, beta, eps=1e-5, act=True, force_two_pass=True)
    )
    assert out_tp.shape == (B, C, H, W)
    assert jnp.allclose(out_tp, ref, atol=1e-4, rtol=1e-4), "two-pass path mismatch"

    print("KERNEL_OK")
</pallas_src>

<mosaic_0001>
module attributes {stable_mosaic.version = 11 : i64} {
  func.func @_fused_kernel(%arg0: memref<2x4x256xf32, #tpu.memory_space<vmem>>, %arg1: memref<1x4x1xf32, #tpu.memory_space<vmem>>, %arg2: memref<1x4x1xf32, #tpu.memory_space<vmem>>, %arg3: memref<2x4x256xf32, #tpu.memory_space<vmem>>) attributes {dimension_semantics = [], scalar_prefetch = 0 : i64, scratch_operands = 0 : i64, tpu.core_type = #tpu.core_type<tc>} {
    %c0 = arith.constant 0 : index
    %c0_0 = arith.constant 0 : index
    %c0_1 = arith.constant 0 : index
    %0 = vector.load %arg0[%c0, %c0_0, %c0_1] : memref<2x4x256xf32, #tpu.memory_space<vmem>>, vector<2x4x256xf32>
    %cst = arith.constant dense<0.000000e+00> : vector<2x4xf32>
    %1 = vector.multi_reduction <add>, %0, %cst [2] : vector<2x4x256xf32> to vector<2x4xf32>
    %2 = vector.shape_cast %1 : vector<2x4xf32> to vector<2x4x1xf32>
    %cst_2 = arith.constant dense<0.000000e+00> : vector<4x1xf32>
    %3 = vector.multi_reduction <add>, %2, %cst_2 [0] : vector<2x4x1xf32> to vector<4x1xf32>
    %4 = vector.shape_cast %3 : vector<4x1xf32> to vector<1x4x1xf32>
    %5 = arith.mulf %0, %0 : vector<2x4x256xf32>
    %cst_3 = arith.constant dense<0.000000e+00> : vector<2x4xf32>
    %6 = vector.multi_reduction <add>, %5, %cst_3 [2] : vector<2x4x256xf32> to vector<2x4xf32>
    %7 = vector.shape_cast %6 : vector<2x4xf32> to vector<2x4x1xf32>
    %cst_4 = arith.constant dense<0.000000e+00> : vector<4x1xf32>
    %8 = vector.multi_reduction <add>, %7, %cst_4 [0] : vector<2x4x1xf32> to vector<4x1xf32>
    %9 = vector.shape_cast %8 : vector<4x1xf32> to vector<1x4x1xf32>
    %cst_5 = arith.constant 0.001953125 : f32
    %10 = vector.broadcast %cst_5 : f32 to vector<1x4x1xf32>
    %11 = arith.mulf %4, %10 : vector<1x4x1xf32>
    %cst_6 = arith.constant 0.001953125 : f32
    %12 = vector.broadcast %cst_6 : f32 to vector<1x4x1xf32>
    %13 = arith.mulf %9, %12 : vector<1x4x1xf32>
    %14 = arith.mulf %11, %11 : vector<1x4x1xf32>
    %15 = arith.subf %13, %14 : vector<1x4x1xf32>
    %cst_7 = arith.constant 0.000000e+00 : f32
    %16 = vector.broadcast %cst_7 : f32 to vector<1x4x1xf32>
    %17 = arith.maximumf %15, %16 : vector<1x4x1xf32>
    %cst_8 = arith.constant 9.99999974E-6 : f32
    %18 = vector.broadcast %cst_8 : f32 to vector<1x4x1xf32>
    %19 = arith.addf %17, %18 : vector<1x4x1xf32>
    %20 = math.rsqrt %19 : vector<1x4x1xf32>
    %c0_9 = arith.constant 0 : index
    %c0_10 = arith.constant 0 : index
    %c0_11 = arith.constant 0 : index
    %21 = vector.load %arg1[%c0_9, %c0_10, %c0_11] : memref<1x4x1xf32, #tpu.memory_space<vmem>>, vector<1x4x1xf32>
    %22 = arith.mulf %21, %20 : vector<1x4x1xf32>
    %c0_12 = arith.constant 0 : index
    %c0_13 = arith.constant 0 : index
    %c0_14 = arith.constant 0 : index
    %23 = vector.load %arg2[%c0_12, %c0_13, %c0_14] : memref<1x4x1xf32, #tpu.memory_space<vmem>>, vector<1x4x1xf32>
    %24 = arith.mulf %11, %22 : vector<1x4x1xf32>
    %25 = arith.subf %23, %24 : vector<1x4x1xf32>
    %26 = vector.broadcast %22 : vector<1x4x1xf32> to vector<2x4x256xf32>
    %27 = arith.mulf %0, %26 : vector<2x4x256xf32>
    %28 = vector.broadcast %25 : vector<1x4x1xf32> to vector<2x4x256xf32>
    %29 = arith.addf %27, %28 : vector<2x4x256xf32>
    %cst_15 = arith.constant 0.000000e+00 : f32
    %30 = vector.broadcast %cst_15 : f32 to vector<2x4x256xf32>
    %31 = arith.maximumf %29, %30 : vector<2x4x256xf32>
    %c0_16 = arith.constant 0 : index
    %c0_17 = arith.constant 0 : index
    %c0_18 = arith.constant 0 : index
    %32 = vector.load %arg3[%c0_16, %c0_17, %c0_18] : memref<2x4x256xf32, #tpu.memory_space<vmem>>, vector<2x4x256xf32>
    tpu.vector_store %arg3[%c0_16, %c0_17, %c0_18], %31 {strides = array<i32>} : memref<2x4x256xf32, #tpu.memory_space<vmem>>, vector<2x4x256xf32>,
    return
  }
}

</mosaic_0001>

<bundles_post_ra>
// kernel: tpu_custom_call.1
= control target key start
LH: loop header
LB: loop body
LE: loop exit
PB: predicated region body
PF: predicated region fallthrough
CT: control target
= control target key end

     0   :  { %8 = vsyncpa [#allocation3], 0  ;;  %s267_s0 = inlined_call_operand.hbm [shape: f32[2,4,256], index: 0, kind: input, shape index: {}]   ;;  %s268_s1 = inlined_call_operand.vmem [shape: f32[1,4,1], index: 1, kind: input, shape index: {}]   ;;  %s269_s2 = inlined_call_operand.vmem [shape: f32[1,4,1], index: 2, kind: input, shape index: {}]   ;;  %s270_s3 = inlined_call_operand.hbm [shape: f32[2,4,256], index: 3, kind: output, shape index: {}]  }
   0x1   :  { %9 = vsyncpa [#allocation4], 0  ;;  %s193_s12 = smov [#allocation2]   ;;  %s145_s16 = scalar_lea.hbm %s267_s0, 256 }
   0x2   :  { %s15_s13 = sshll.u32 %s193_s12, 4  ;;  %p146_p0 = scmp.ne.s32.totalorder %s267_s0, %s145_s16  ;;  %s16_s13 = int_to_ptr.vmem [resolvable:$true] %s15_s13 }
   0x3   :  { %p149_p1 = scmp.lt.u32.totalorder %s145_s16, %s267_s0 }
   0x5   :  { %p151_p2 = pnand %p149_p1, %p146_p0 }
   0x7   :  { %154 = shalt.err (!%p151_p2)
}
   0x8   :  { %s155_s21 = scalar_lea.vmem %s16_s13, 256  ;;  %p160_p4 = scmp.lt.s32.totalorder %s16_s13, %s16_s13 }
   0x9   :  { %p156_p3 = scmp.ne.s32.totalorder %s16_s13, %s155_s21  ;;  %p161_p5 = scmp.lt.s32.totalorder %s155_s21, %s155_s21 }
   0xb   :  { %p162_p6 = por %p161_p5, %p160_p4 }
   0xd   :  { %p163_p7 = pnand %p162_p6, %p156_p3 }
   0xf   :  { %166 = shalt.err (!%p163_p7)
}
  0x10   :  { %s194_s22 = smov 128   ;;  %s195_s23 = smov 8  }
  0x11   :  { %21 = dma.hbm_to_vmem [thread:$0]  %s267_s0, 256, %s16_s13, [#allocation3], %s194_s22, %s194_s22, %s195_s23  }
  0x12   :  { %189 = dma.done.wait [#allocation3], 256  }
  0x13   :  { %190 = vsyncadd [#allocation3], 4294967040  ;;  %vm37_vm0 = vcmask 1043456   ;;  %v29_v0 = vld [vmem:[#allocation2] sm:$0xff]  ;;  %v30_v1 = vld [vmem:[#allocation2 + $0x8] sm:$0xff]  ;;  %v196_v20 = vmov 0   ;;  %v91_v45 = vlaneseq }
  0x14   :  { %v33_v2 = vcombine.high %v29_v0, %v29_v0  ;;  %v38_v3 = vsel %vm37_vm0, %v29_v0, 0.0  ;;  %v51_v4 = vmul.f32 %v29_v0, %v29_v0  ;;  %v34_v5 = vcombine.high %v30_v1, %v30_v1  ;;  %139 = vset.pattern.permute.xlu0 %v196_v20  ;;  %140 = vset.pattern.permute.xlu1 %v196_v20  ;;  %v79_v37 = vld [vmem:[%s268_s1] sm:$0xf]  ;;  %s198_s1 = smov [#allocation5]  }
  0x15   :  { %v43_v6 = vsel %vm37_vm0, %v30_v1, 0.0  ;;  %v52_v7 = vmul.f32 %v30_v1, %v30_v1  ;;  %v81_v40 = vld [vmem:[%s269_s2] sm:$0xf]  ;;  %v197_v43 = vmov 839922192   ;;  %v92_v47 = vshrl.u32 %v91_v45, 7 }
  0x16   :  { %v39_v8 = vsel %vm37_vm0, %v33_v2, 0.0  ;;  %v55_v9 = vcombine.high %v51_v4, %v51_v4  ;;  %v59_v10 = vsel %vm37_vm0, %v51_v4, 0.0  ;;  %v44_v11 = vsel %vm37_vm0, %v34_v5, 0.0  ;;  %s121_s29 = sshll.u32 %s198_s1, 4  ;;  %s122_s29 = int_to_ptr.vmem [resolvable:$true] %s121_s29 }
  0x17   :  { %v40_v12 = vadd.f32 %v39_v8, %v38_v3  ;;  %v56_v13 = vcombine.high %v52_v7, %v52_v7  ;;  %v64_v15 = vsel %vm37_vm0, %v52_v7, 0.0  ;;  %v45_v17 = vadd.f32 %v44_v11, %v43_v6  ;;  %s167_s2 = scalar_lea.vmem %s122_s29, 256  ;;  %p172_p9 = scmp.lt.s32.totalorder %s122_s29, %s122_s29 }
  0x18   :  { %v60_v14 = vsel %vm37_vm0, %v55_v9, 0.0  ;;  %v89_v44 = vunpack.c.l.s4 %v197_v43  ;;  %p168_p8 = scmp.ne.s32.totalorder %s122_s29, %s167_s2  ;;  %p173_p10 = scmp.lt.s32.totalorder %s167_s2, %s167_s2 }
  0x19   :  { %41 = vadd.xlane.f32.xlu0 %v40_v12  ;;  %v61_v16 = vadd.f32 %v60_v14, %v59_v10  ;;  %v65_v18 = vsel %vm37_vm0, %v56_v13, 0.0 }
  0x1a   :  { %v66_v19 = vadd.f32 %v65_v18, %v64_v15  ;;  %v90_v46 = vunpack.c.0.s8 %v89_v44  ;;  %p174_p11 = por %p173_p10, %p172_p9 }
  0x1b   :  { %62 = vadd.xlane.f32.xlu1 %v61_v16 }
  0x1c   :  { %v93_v48 = vsub.s32 %v90_v46, %v92_v47  ;;  %p175_p12 = pnand %p174_p11, %p168_p8 }
  0x1d   :  { %46 = vadd.xlane.f32.xlu0 %v45_v17 }
  0x1f   :  { %67 = vadd.xlane.f32.xlu1 %v66_v19 }
  0xa6   :  { %v42_v21 = vpop.xlane.xlu0 %41 }
  0xa7   :  { %v48_v24 = vsel %vm37_vm0, %v42_v21, 0.0 }
  0xa8   :  { %v63_v22 = vpop.xlane.xlu1 %62 }
  0xa9   :  { %v69_v28 = vsel %vm37_vm0, %v63_v22, 0.0 }
  0xaa   :  { %v47_v23 = vpop.xlane.xlu0 %46 }
  0xab   :  { %v49_v25 = vsel %vm37_vm0, %v47_v23, 0.0 }
  0xac   :  { %v50_v26 = vadd.f32 %v49_v25, %v48_v24  ;;  %v68_v27 = vpop.xlane.xlu1 %67 }
  0xad   :  { %v70_v29 = vsel %vm37_vm0, %v68_v27, 0.0 }
  0xae   :  { %v72_v30 = vmul.f32 0.001953125, %v50_v26  ;;  %v71_v31 = vadd.f32 %v70_v29, %v69_v28 }
  0xb0   :  { %v74_v32 = vmul.f32 %v72_v30, %v72_v30  ;;  %v73_v33 = vmul.f32 0.001953125, %v71_v31 }
  0xb2   :  { %v75_v34 = vsub.f32 %v73_v33, %v74_v32 }
  0xb4   :  { %v76_v35 = vmax.f32 %v75_v34, 0.0 }
  0xb6   :  { %v77_v36 = vadd.f32 1e-05, %v76_v35 }
  0xb8   :  { %143 = vrsqrt.f32 %v77_v36 }
  0xc2   :  { %v144_v38 = vpop.eup %143 }
  0xc3   :  { %v80_v39 = vmul.f32 %v144_v38, %v79_v37 }
  0xc5   :  { %86 = vperm.xlu0 %139, %v80_v39   ;;  %v82_v41 = vmul.f32 %v80_v39, %v72_v30 }
  0xc7   :  { %v83_v42 = vsub.f32 %v81_v40, %v82_v41 }
  0xc9   :  { %100 = vperm.xlu1 %140, %v83_v42  }
 0x144   :  { %v87_v49 = vpop.permute.xlu0 %86 }
 0x145   :  { %v94_v50 = vrot.slane %v87_v49, %v93_v48 }
 0x147   :  { %v96_v52 = vmul.f32 %v94_v50, %v29_v0  ;;  %v97_v53 = vmul.f32 %v94_v50, %v30_v1 }
 0x148   :  { %v101_v51 = vpop.permute.xlu1 %100 }
 0x149   :  { %v108_v54 = vrot.slane %v101_v51, %v93_v48 }
 0x14b   :  { %v110_v55 = vadd.f32 %v108_v54, %v96_v52  ;;  %v111_v56 = vadd.f32 %v108_v54, %v97_v53 }
 0x14d   :  { %v112_v57 = vmax.f32 %v110_v55, 0.0  ;;  %v113_v58 = vmax.f32 %v111_v56, 0.0 }
 0x14f   :  { %114 = vst [vmem:[#allocation5] sm:$0xff] %v112_v57  ;;  %115 = vst [vmem:[#allocation5 + $0x8] sm:$0xff] %v113_v58 }
 0x150   :  { %178 = shalt.err (!%p175_p12)
}
 0x151   :  { %s179_s5 = scalar_lea.hbm %s270_s3, 256 }
 0x152   :  { %p180_p13 = scmp.ne.s32.totalorder %s270_s3, %s179_s5  ;;  %p183_p0 = scmp.lt.u32.totalorder %s179_s5, %s270_s3 }
 0x154   :  { %p185_p1 = pnand %p183_p0, %p180_p13 }
 0x156   :  { %188 = shalt.err (!%p185_p1)
}
 0x157   :  { %127 = dma.vmem_to_hbm [thread:$0]  %s122_s29, 256, %s270_s3, [#allocation4], %s194_s22, %s194_s22, %s195_s23  }
 0x158   :  { %191 = dma.done.wait [#allocation4], 256  }
 0x159   :  { %192 = vsyncadd [#allocation4], 4294967040 }
 0x15a   :  { %131 = vsyncpa [#allocation3], 1 }
 0x15b   :  { %132 = vsyncpa [#allocation4], 1 }

</bundles_post_ra>
